<compile_context>
chip_gen: v7x
topology: tpu7x:2x2x1
jax: 0.10.0
libtpu: 0.0.40
codegen_flags: <defaults>
</compile_context>

<pallas_src>
import functools

import jax
import jax.numpy as jnp
from jax.experimental import pallas as pl
from jax.experimental.pallas import tpu as pltpu


def _label_smoothing_kernel(pred_ref, tgt_ref, out_ref, *, smoothing, n_total,
                            tile_n, needs_mask):
    i = pl.program_id(0)

    pred = pred_ref[...].astype(jnp.float32)        # (tile_n, C), f32 math
    tgt = tgt_ref[...]                              # (tile_n, 1) int32
    tn, c = pred.shape

    confidence = jnp.float32(1.0 - smoothing)
    smooth_val = jnp.float32(smoothing / (c - 1))

    # Stable logsumexp per row (EUP exp + XLU reductions; off the VALU slots).
    row_max = jnp.max(pred, axis=-1, keepdims=True)                      # (tn,1)
    sum_exp = jnp.sum(jnp.exp(pred - row_max), axis=-1, keepdims=True)   # (tn,1)
    lse = jnp.log(sum_exp) + row_max                                     # (tn,1)

    # Fused weighted sum: since sum(true_dist) == 1,
    #   loss_row = lse - sum_c( true_dist[c] * pred[c] )
    col_idx = jax.lax.broadcasted_iota(jnp.int32, (tn, c), 1)
    weights = jnp.where(col_idx == tgt, confidence, smooth_val)          # (tn,C)
    weighted = jnp.sum(weights * pred, axis=-1, keepdims=True)           # (tn,1)

    per_row = lse - weighted                                             # (tn,1)

    if not needs_mask:
        out_ref[0, 0] = jnp.sum(per_row)
    else:
        last = pl.num_programs(0) - 1

        @pl.when(i < last)
        def _full_tile():
            out_ref[0, 0] = jnp.sum(per_row)

        @pl.when(i == last)
        def _partial_tile():
            # Rows beyond n_total are padding (garbage pred -> possibly
            # inf/NaN in per_row); the select (not an arithmetic mask) keeps
            # them out of the sum.
            row_idx = i * tile_n + jax.lax.broadcasted_iota(
                jnp.int32, (tn, 1), 0)
            out_ref[0, 0] = jnp.sum(
                jnp.where(row_idx < n_total, per_row, jnp.float32(0.0)))


def _vmem_capacity_bytes():
    try:
        return int(pltpu.get_tpu_info().vmem_capacity_bytes)
    except Exception:
        return 64 * 1024 * 1024       # conservative (v7x-sized) fallback


def _sublane_multiple(dtype):
    itemsize = jnp.dtype(dtype).itemsize
    return max(8, 32 // itemsize)     # 8 for f32, 16 for bf16, 32 for 8-bit


def _pick_tile_n(n, c, pred_itemsize, vmem_budget, sublane):
    """Largest row tile whose full VMEM working set fits `vmem_budget`.

    Per-row accounting:
      2 x double-buffered pred block rows:        2 * c * itemsize
      2 x double-buffered target block rows:      2 * 512 B (int32 lane-padded)
      ~3 f32 (tile, C) temporaries (cast/exp/weights): 3 * c * 4
    """
    per_row = 2 * (c * pred_itemsize + 512) + 3 * c * 4
    rows = max(sublane, vmem_budget // per_row)
    if rows >= n:
        return n                       # single block = full array dims, always legal
    return max(sublane, (rows // sublane) * sublane)


def label_smoothing_loss(pred, target, *, classes, smoothing=0.1, tile_n=None):
    """pred: (N, C) float (f32 or bf16), target: (N,) int. Returns f32 scalar."""
    n, c = pred.shape
    assert c == classes
    tgt2d = target.astype(jnp.int32).reshape(n, 1)

    itemsize = jnp.dtype(pred.dtype).itemsize
    sublane = _sublane_multiple(pred.dtype)

    vmem_cap = _vmem_capacity_bytes()
    small_vmem = vmem_cap <= 64 * 1024 * 1024          # v7x
    vmem_budget = (40 << 20) if small_vmem else (88 << 20)
    vmem_limit = (48 << 20) if small_vmem else (96 << 20)

    if tile_n is None:
        tile_n = _pick_tile_n(n, c, itemsize, vmem_budget, sublane)

    num_tiles = -(-n // tile_n)
    needs_mask = (n % tile_n) != 0

    kernel = functools.partial(
        _label_smoothing_kernel,
        smoothing=smoothing, n_total=n, tile_n=tile_n, needs_mask=needs_mask,
    )

    cost = pl.CostEstimate(
        flops=6 * n * c,                 # sub/cmp/select/mul + 2 reductions
        transcendentals=n * c,           # exp
        bytes_accessed=n * c * itemsize + n * 4 + num_tiles * 4,
    )

    partials = pl.pallas_call(
        kernel,
        out_shape=jax.ShapeDtypeStruct((num_tiles, 1), jnp.float32),
        grid=(num_tiles,),
        in_specs=[
            pl.BlockSpec((tile_n, c), lambda i: (i, 0)),
            pl.BlockSpec((tile_n, 1), lambda i: (i, 0)),
        ],
        # One (1,1) SMEM partial sum per grid step; no carried state, so the
        # row axis can be "parallel" (uses both TensorCores on v7x).
        out_specs=pl.BlockSpec((1, 1), lambda i: (i, 0),
                               memory_space=pltpu.MemorySpace.SMEM),
        compiler_params=pltpu.CompilerParams(
            dimension_semantics=("parallel",),
            vmem_limit_bytes=vmem_limit,
        ),
        cost_estimate=cost,
    )(pred, tgt2d)

    # Final reduction + mean over the true global batch size (padded rows of
    # the last partial tile were masked to 0 inside the kernel).
    return jnp.sum(partials) / jnp.float32(n)


def _reference_loss(pred, target, *, classes, smoothing=0.1):
    confidence = 1.0 - smoothing
    logp = jax.nn.log_softmax(pred.astype(jnp.float32), axis=-1)
    true_dist = jnp.full_like(logp, smoothing / (classes - 1))
    true_dist = true_dist.at[jnp.arange(pred.shape[0]), target].set(confidence)
    return jnp.mean(jnp.sum(-true_dist * logp, axis=-1))


if __name__ == "__main__":
    smoothing = 0.1
    key = jax.random.PRNGKey(0)

    # Case 1: tiny shape, single block (full-array BlockSpec path).
    N1, C1 = 8, 32
    k1p, k1t, key = jax.random.split(key, 3)
    pred1 = jax.random.normal(k1p, (N1, C1), dtype=jnp.float32)
    tgt1 = jax.random.randint(k1t, (N1,), 0, C1, dtype=jnp.int32)
    loss1 = jax.block_until_ready(
        label_smoothing_loss(pred1, tgt1, classes=C1, smoothing=smoothing))
    ref1 = _reference_loss(pred1, tgt1, classes=C1, smoothing=smoothing)
    assert jnp.allclose(loss1, ref1, atol=1e-5, rtol=1e-5), (loss1, ref1)

    # Case 2: exercises the row grid, per-tile partial sums and last-tile
    # masking (N not a multiple of the tile), f32 inputs.
    N2, C2 = 100, 32
    k2p, k2t, key = jax.random.split(key, 3)
    pred2 = jax.random.normal(k2p, (N2, C2), dtype=jnp.float32)
    tgt2 = jax.random.randint(k2t, (N2,), 0, C2, dtype=jnp.int32)
    loss2 = jax.block_until_ready(
        label_smoothing_loss(pred2, tgt2, classes=C2, smoothing=smoothing,
                             tile_n=16))
    ref2 = _reference_loss(pred2, tgt2, classes=C2, smoothing=smoothing)
    assert jnp.allclose(loss2, ref2, atol=1e-5, rtol=1e-5), (loss2, ref2)

    # Case 3: bf16 inputs (dtype-aware path, in-kernel f32 upcast), tiled grid
    # with a partial last tile.
    N3, C3 = 40, 32
    k3p, k3t = jax.random.split(key)
    pred3 = jax.random.normal(k3p, (N3, C3), dtype=jnp.float32).astype(jnp.bfloat16)
    tgt3 = jax.random.randint(k3t, (N3,), 0, C3, dtype=jnp.int32)
    loss3 = jax.block_until_ready(
        label_smoothing_loss(pred3, tgt3, classes=C3, smoothing=smoothing,
                             tile_n=16))
    ref3 = _reference_loss(pred3, tgt3, classes=C3, smoothing=smoothing)
    assert jnp.allclose(loss3, ref3, atol=1e-4, rtol=1e-4), (loss3, ref3)

    print("KERNEL_OK")
</pallas_src>

<mosaic_0001>
module attributes {stable_mosaic.version = 11 : i64} {
  func.func @_label_smoothing_kernel(%arg0: i32, %arg1: memref<8x32xf32, #tpu.memory_space<vmem>>, %arg2: memref<8x1xi32, #tpu.memory_space<vmem>>, %arg3: memref<1x1xf32, #tpu.memory_space<smem>>) attributes {dimension_semantics = [#tpu.dimension_semantics<parallel>], iteration_bounds = array<i64: 1>, scalar_prefetch = 0 : i64, scratch_operands = 0 : i64, tpu.core_type = #tpu.core_type<tc>, window_params = [{transform_indices = @transform_0, window_bounds = array<i64: 8, 32>}, {transform_indices = @transform_1, window_bounds = array<i64: 8, 1>}, {transform_indices = @transform_2, window_bounds = array<i64: 1, 1>}]} {
    %c0 = arith.constant 0 : index
    %c0_0 = arith.constant 0 : index
    %0 = vector.load %arg1[%c0, %c0_0] : memref<8x32xf32, #tpu.memory_space<vmem>>, vector<8x32xf32>
    %c0_1 = arith.constant 0 : index
    %c0_2 = arith.constant 0 : index
    %1 = vector.load %arg2[%c0_1, %c0_2] : memref<8x1xi32, #tpu.memory_space<vmem>>, vector<8x1xi32>
    %cst = arith.constant dense<0xFF800000> : vector<8xf32>
    %2 = vector.multi_reduction <maximumf>, %0, %cst [1] : vector<8x32xf32> to vector<8xf32>
    %3 = vector.shape_cast %2 : vector<8xf32> to vector<8x1xf32>
    %4 = vector.broadcast %3 : vector<8x1xf32> to vector<8x32xf32>
    %5 = arith.subf %0, %4 : vector<8x32xf32>
    %6 = math.exp %5 : vector<8x32xf32>
    %cst_3 = arith.constant dense<0.000000e+00> : vector<8xf32>
    %7 = vector.multi_reduction <add>, %6, %cst_3 [1] : vector<8x32xf32> to vector<8xf32>
    %8 = vector.shape_cast %7 : vector<8xf32> to vector<8x1xf32>
    %9 = math.log %8 : vector<8x1xf32>
    %10 = arith.addf %9, %3 : vector<8x1xf32>
    %11 = tpu.iota {dimensions = array<i32: 1>} : vector<8x32xi32>
    %12 = vector.broadcast %1 : vector<8x1xi32> to vector<8x32xi32>
    %13 = arith.cmpi eq, %11, %12 : vector<8x32xi32>
    %cst_4 = arith.constant 0.899999976 : f32
    %cst_5 = arith.constant 0.0032258064 : f32
    %14 = vector.broadcast %cst_4 : f32 to vector<8x32xf32>
    %15 = vector.broadcast %cst_5 : f32 to vector<8x32xf32>
    %16 = arith.select %13, %14, %15 : vector<8x32xi1>, vector<8x32xf32>
    %17 = arith.mulf %16, %0 : vector<8x32xf32>
    %cst_6 = arith.constant dense<0.000000e+00> : vector<8xf32>
    %18 = vector.multi_reduction <add>, %17, %cst_6 [1] : vector<8x32xf32> to vector<8xf32>
    %19 = vector.shape_cast %18 : vector<8xf32> to vector<8x1xf32>
    %20 = arith.subf %10, %19 : vector<8x1xf32>
    %21 = vector.shape_cast %20 : vector<8x1xf32> to vector<1x8x1xf32>
    %cst_7 = arith.constant dense<0.000000e+00> : vector<1xf32>
    %22 = vector.multi_reduction <add>, %21, %cst_7 [1, 2] : vector<1x8x1xf32> to vector<1xf32>
    %23 = vector.shape_cast %22 : vector<1xf32> to vector<1x1x1xf32>
    %24 = vector.extract %23[0, 0, 0] : f32 from vector<1x1x1xf32>
    %c0_8 = arith.constant 0 : index
    %c0_9 = arith.constant 0 : index
    %25 = memref.load %arg3[%c0_8, %c0_9] : memref<1x1xf32, #tpu.memory_space<smem>>
    memref.store %24, %arg3[%c0_8, %c0_9] : memref<1x1xf32, #tpu.memory_space<smem>>
    return
  }
  func.func @transform_0(%arg0: i32) -> (i32, i32) {
    %c0_i32 = arith.constant 0 : i32
    %c0_i32_0 = arith.constant 0 : i32
    return %arg0, %c0_i32 : i32, i32
  }
  func.func @transform_1(%arg0: i32) -> (i32, i32) {
    %c0_i32 = arith.constant 0 : i32
    %c0_i32_0 = arith.constant 0 : i32
    return %arg0, %c0_i32 : i32, i32
  }
  func.func @transform_2(%arg0: i32) -> (i32, i32) {
    %c0_i32 = arith.constant 0 : i32
    %c0_i32_0 = arith.constant 0 : i32
    return %arg0, %c0_i32 : i32, i32
  }
}

</mosaic_0001>

<bundles_post_ra>
// kernel: tpu_custom_call.1
= control target key start
LH: loop header
LB: loop body
LE: loop exit
PB: predicated region body
PF: predicated region fallthrough
CT: control target
= control target key end

     0   :  { %vm14_vm0 = vcmask 261120   ;;  %s126_s0 = inlined_call_operand.vmem [shape: f32[8,32], index: 0, kind: input, shape index: {}]   ;;  %s127_s1 = inlined_call_operand.vmem [shape: s32[8,1], index: 1, kind: input, shape index: {}]   ;;  %s128_s2 = inlined_call_operand.hbm [shape: f32[1,1], index: 2, kind: output, shape index: {}]  }
   0x1   :  { %v12_v0 = vld [vmem:[%s126_s0] sm:$0xff] }
   0x2   :  { %7 = vsyncpa [#allocation3], 0  ;;  %v15_v1 = vsel %vm14_vm0, %v12_v0, -inf  ;;  %v87_v2 = vmov 0   ;;  %v13_v3 = vld [vmem:[%s127_s1] sm:$0xff]  ;;  %v27_v6 = vlaneseq  ;;  %vm39_vm2 = vcmask 7168  }
   0x3   :  { %70 = vset.pattern.permute.xlu0 %v87_v2  ;;  %v88_v10 = vmov 0.0032258064   ;;  %s75_s14 = scalar_lea.hbm %s128_s2, 16 }
   0x4   :  { %16 = vmax.xlane.f32.xlu0 %v15_v1  ;;  %v28_v8 = vand.u32 127, %v27_v6  ;;  %p76_p0 = scmp.ne.s32.totalorder %s128_s2, %s75_s14  ;;  %p79_p1 = scmp.lt.u32.totalorder %s75_s14, %s128_s2 }
   0x6   :  { %p81_p2 = pnand %p79_p1, %p76_p0 }
  0x1a   :  { %30 = vperm.xlu0 %70, %v13_v3  }
  0x91   :  { %v17_v4 = vpop.xlane.xlu0 %16 }
  0x92   :  { %v18_v5 = vsub.f32 %v12_v0, %v17_v4 }
  0x94   :  { %v19_v7 = vmul.f32 1.442695, %v18_v5 }
  0x96   :  { %71 = vpow2.f32 %v19_v7 }
  0x99   :  { %v31_v9 = vpop.permute.xlu0 %30 }
  0x9a   :  { %vm32_vm1 = vcmp.eq.s32.totalorder %v28_v8, %v31_v9 }
  0x9b   :  { %v33_v11 = vsel %vm32_vm1, 0.9, %v88_v10 }
  0x9c   :  { %v34_v12 = vmul.f32 %v33_v11, %v12_v0 }
  0x9e   :  { %v35_v15 = vsel %vm14_vm0, %v34_v12, 0.0 }
  0xa0   :  { %v72_v13 = vpop.eup %71 }
  0xa1   :  { %v21_v14 = vsel %vm14_vm0, %v72_v13, 0.0 }
  0xa2   :  { %22 = vadd.xlane.f32.xlu1 %v21_v14 }
  0xa6   :  { %36 = vadd.xlane.f32.xlu1 %v35_v15 }
 0x12f   :  { %v23_v16 = vpop.xlane.xlu1 %22 }
 0x130   :  { %73 = vlog2.f32 %v23_v16 }
 0x133   :  { %v37_v19 = vpop.xlane.xlu1 %36 }
 0x13a   :  { %v74_v17 = vpop.eup %73 }
 0x13b   :  { %v25_v18 = vmul.f32 0.6931472, %v74_v17 }
 0x13d   :  { %v26_v20 = vadd.f32 %v25_v18, %v17_v4 }
 0x13f   :  { %v38_v21 = vsub.f32 %v26_v20, %v37_v19 }
 0x141   :  { %v40_v22 = vsel %vm39_vm2, %v38_v21, 0.0 }
 0x142   :  { %41 = vadd.xlane.f32.xlu1 %v40_v22 }
 0x1cf   :  { %v42_v23 = vpop.xlane.xlu1 %41 }
 0x1d0   :  { %v43_v24 = vrot.slane %v42_v23, 4 }
 0x1d2   :  { %v44_v25 = vadd.f32 %v43_v24, %v42_v23 }
 0x1d4   :  { %v45_v26 = vrot.slane %v44_v25, 2 }
 0x1d6   :  { %v46_v27 = vadd.f32 %v45_v26, %v44_v25 }
 0x1d8   :  { %v47_v28 = vrot.slane %v46_v27, 1 }
 0x1da   :  { %v48_v29 = vadd.f32 %v47_v28, %v46_v27 }
 0x1dc   :  { %65 = vpush %v48_v29 }
 0x20d   :  { %s66_s0 = spop %65 }
 0x20e   :  { %51 = sst [smem:[#allocation2]] %s66_s0 }
 0x20f   :  { %84 = shalt.err (!%p81_p2)
}
 0x210   :  { %s89_s19 = smov [#allocation2]  }
 0x211   :  { %59 = dma.smem_to_hbm %s89_s19, 16, %s128_s2, [#allocation3]  }
 0x212   :  { %85 = dma.done.wait [#allocation3], 16  }
 0x213   :  { %86 = vsyncadd [#allocation3], 4294967280 }
 0x214   :  { %63 = sfence }
 0x215   :  { %64 = vsyncpa [#allocation3], 1 }

</bundles_post_ra>
